<compile_context>
chip_gen: v6e
topology: v6e:2x2x1
jax: 0.10.0
libtpu: 0.0.40
codegen_flags: <defaults>
</compile_context>

<pallas_src>
import functools

import jax
import jax.numpy as jnp
from jax import lax
from jax.experimental import pallas as pl
from jax.experimental.pallas import tpu as pltpu


def _mod_const(a, d):
    # power-of-two divisors lower to cheap bit ops on the VPU
    if d & (d - 1) == 0:
        return a & (d - 1)
    return a % d


def _floor_div_const(a, d):
    if d & (d - 1) == 0:
        return a >> (d.bit_length() - 1)
    return a // d


def basic_block_kernel(H, W, Cp, x_ref, w1_ref, b1_ref, w2_ref, b2_ref,
                       out_ref, stack_ref):
    # x_ref     : (Cp, L)       L = nb*H*W; channels on sublanes, batch*spatial on lanes
    # w*_ref    : (Cp, 9*Cp)    per-tap weights packed along K, BN scale pre-folded
    # b*_ref    : (Cp, 1)       folded BN bias
    # out_ref   : (Cp, L)
    # stack_ref : (9*Cp, L)     VMEM im2col scratch (reused by both convs)
    L = x_ref.shape[1]
    HW = H * W

    x = x_ref[...]  # (Cp, L) f32

    # per-lane (row, col) within each image; hoisted, shared by both convs
    lane = lax.broadcasted_iota(jnp.int32, (1, L), 1)
    local = _mod_const(lane, HW)
    row = _floor_div_const(local, W)
    col = _mod_const(local, W)

    # only the 4 primitive boundary masks stay live; AND'ed per tap below
    row_ge1 = row >= 1
    row_lt = row < (H - 1)
    col_ge1 = col >= 1
    col_lt = col < (W - 1)

    taps = [(dh, dw) for dh in (-1, 0, 1) for dw in (-1, 0, 1)]

    def build_stack(inp):
        # im2col along sublanes: tap t lands in rows [t*Cp, (t+1)*Cp) of the
        # scratch (aligned full sublane tiles, since Cp is a multiple of 8).
        # Writing each tap straight to VMEM bounds its vreg live range.
        for t, (dh, dw) in enumerate(taps):
            s = dh * W + dw
            shifted = inp if s == 0 else pltpu.roll(inp, (-s) % L, axis=1)
            m = None
            if dh == -1:
                m = row_ge1
            elif dh == 1:
                m = row_lt
            if dw == -1:
                m = col_ge1 if m is None else m & col_ge1
            elif dw == 1:
                m = col_lt if m is None else m & col_lt
            if m is not None:
                shifted = jnp.where(m, shifted, 0.0)
            stack_ref[t * Cp:(t + 1) * Cp, :] = shifted

    # conv1 (single K=9*Cp matmul, BN scale folded into weights) -> bias -> relu
    build_stack(x)
    h = jnp.maximum(
        jnp.dot(w1_ref[...], stack_ref[...], preferred_element_type=jnp.float32)
        + b1_ref[...], 0.0)

    # conv2 -> bias -> +identity -> relu
    build_stack(h)
    y = jnp.maximum(
        jnp.dot(w2_ref[...], stack_ref[...], preferred_element_type=jnp.float32)
        + b2_ref[...] + x, 0.0)

    out_ref[...] = y.astype(out_ref.dtype)  # lane-dense, unmasked stores


def fold_bn(gamma, beta, running_mean, running_var, eps=1e-5):
    scale = gamma / jnp.sqrt(running_var + eps)
    bias = beta - running_mean * scale
    return scale.astype(jnp.float32), bias.astype(jnp.float32)


def pack_weights(w_hwio, scale, Cp):
    """HWIO (3,3,Cin,Cout) conv weights -> (Cp, 9*Cp) packed matrix with the BN
    scale folded in: out[co, t*Cp + ci] = scale[co] * w[kh, kw, ci, co]."""
    Cin, Cout = w_hwio.shape[2], w_hwio.shape[3]
    wt = jnp.transpose(w_hwio.astype(jnp.float32), (0, 1, 3, 2)).reshape(9, Cout, Cin)
    wt = wt * scale.reshape(1, Cout, 1)
    wt = jnp.pad(wt, ((0, 0), (0, Cp - Cout), (0, Cp - Cin)))
    return jnp.transpose(wt, (1, 0, 2)).reshape(Cp, 9 * Cp)


def basic_block_forward(x_nchw, w1, bn1, w2, bn2, eps=1e-5, batch_tile=None):
    """x_nchw: (N, C, H, W) f32; conv weights in HWIO (3,3,Cin,Cout), stride=1,
    downsample=None (inplanes == planes). batch_tile: images per grid step.
    Default folds the whole batch into one step (right for small shapes); for
    realistic batches on v7x pick batch_tile=N//2 (or smaller) so both
    TensorCores get work and the x/out DMA pipelines across >=2 steps."""
    N, Cin, H, W = x_nchw.shape
    Cout = w1.shape[-1]
    assert Cin == Cout, "downsample=None requires inplanes == planes"
    HW = H * W
    nb = N if batch_tile is None else batch_tile
    assert N % nb == 0
    L = nb * HW
    assert L % 128 == 0, "batch_tile*H*W must be a multiple of 128 (lane-dense tiles)"

    Cp = ((max(Cin, Cout) + 7) // 8) * 8  # pad channels to a full sublane tile
    Cp = max(Cp, 8)

    s1, b1 = fold_bn(*bn1, eps=eps)
    s2, b2 = fold_bn(*bn2, eps=eps)

    # channels -> sublanes (zero-padded to Cp), flattened (batch, H, W) -> lanes
    x_flat = jnp.transpose(x_nchw.astype(jnp.float32), (1, 0, 2, 3)).reshape(Cin, N * HW)
    x_flat = jnp.pad(x_flat, ((0, Cp - Cin), (0, 0)))

    w1_p = pack_weights(w1, s1, Cp)                                  # (Cp, 9*Cp)
    w2_p = pack_weights(w2, s2, Cp)
    b1_p = jnp.pad(b1.reshape(Cout, 1), ((0, Cp - Cout), (0, 0)))    # (Cp, 1)
    b2_p = jnp.pad(b2.reshape(Cout, 1), ((0, Cp - Cout), (0, 0)))

    # explicit VMEM budget (review: generation-aware sizing, v7x has 64 MiB)
    f32 = 4
    block_bytes = Cp * L * f32          # one x / out block
    w_bytes = Cp * 9 * Cp * f32
    scratch_bytes = 9 * Cp * L * f32
    needed = 2 * (2 * block_bytes) + 2 * (2 * w_bytes) + scratch_bytes
    vmem_limit = int(min(100 << 20, max(16 << 20, 2 * needed)))

    kernel = functools.partial(basic_block_kernel, H, W, Cp)

    out_flat = pl.pallas_call(
        kernel,
        out_shape=jax.ShapeDtypeStruct((Cp, N * HW), jnp.float32),
        grid_spec=pltpu.PrefetchScalarGridSpec(
            num_scalar_prefetch=0,
            grid=(N // nb,),
            in_specs=[
                pl.BlockSpec((Cp, L), lambda t: (0, t)),
                pl.BlockSpec((Cp, 9 * Cp), lambda t: (0, 0)),
                pl.BlockSpec((Cp, 1), lambda t: (0, 0)),
                pl.BlockSpec((Cp, 9 * Cp), lambda t: (0, 0)),
                pl.BlockSpec((Cp, 1), lambda t: (0, 0)),
            ],
            out_specs=pl.BlockSpec((Cp, L), lambda t: (0, t)),
            scratch_shapes=[pltpu.VMEM((9 * Cp, L), jnp.float32)],
        ),
        compiler_params=pltpu.CompilerParams(
            dimension_semantics=("parallel",),
            vmem_limit_bytes=vmem_limit),
    )(x_flat, w1_p, b1_p, w2_p, b2_p)

    out = out_flat[:Cout].reshape(Cout, N, H, W)
    return jnp.transpose(out, (1, 0, 2, 3))


def basic_block_reference(x_nchw, w1, bn1, w2, bn2, eps=1e-5):
    """Plain-JAX reference (eval-mode BN), used for validation only."""
    x = jnp.transpose(x_nchw, (0, 2, 3, 1)).astype(jnp.float32)
    dn = ('NHWC', 'HWIO', 'NHWC')

    def conv(h, w):
        return lax.conv_general_dilated(h, w, window_strides=(1, 1),
                                        padding='SAME', dimension_numbers=dn)

    def fold(gamma, beta, mean, var):
        scale = gamma / jnp.sqrt(var + eps)
        return scale, beta - mean * scale

    s1, b1 = fold(*bn1)
    s2, b2 = fold(*bn2)
    out = jnp.maximum(conv(x, w1) * s1 + b1, 0.0)
    out = conv(out, w2) * s2 + b2 + x
    out = jnp.maximum(out, 0.0)
    return jnp.transpose(out, (0, 3, 1, 2))


if __name__ == "__main__":
    # Small shapes: batch=2, inplanes=planes=4, spatial=16x16, stride=1, downsample=None
    N, C, H, W = 2, 4, 16, 16
    key = jax.random.PRNGKey(0)
    kx, kw1, kw2, kg1, kb1, km1, kv1, kg2, kb2, km2, kv2 = jax.random.split(key, 11)

    x = jax.random.normal(kx, (N, C, H, W), jnp.float32)

    # conv weights in HWIO (3, 3, Cin, Cout); no bias (matches conv3x3)
    w1 = jax.random.normal(kw1, (3, 3, C, C), jnp.float32) * 0.1
    w2 = jax.random.normal(kw2, (3, 3, C, C), jnp.float32) * 0.1

    bn1 = (jax.random.uniform(kg1, (C,), jnp.float32, 0.5, 1.5),   # gamma
           jax.random.normal(kb1, (C,), jnp.float32) * 0.1,        # beta
           jax.random.normal(km1, (C,), jnp.float32) * 0.1,        # running_mean
           jax.random.uniform(kv1, (C,), jnp.float32, 0.5, 1.5))   # running_var
    bn2 = (jax.random.uniform(kg2, (C,), jnp.float32, 0.5, 1.5),
           jax.random.normal(kb2, (C,), jnp.float32) * 0.1,
           jax.random.normal(km2, (C,), jnp.float32) * 0.1,
           jax.random.uniform(kv2, (C,), jnp.float32, 0.5, 1.5))

    out = basic_block_forward(x, w1, bn1, w2, bn2)
    out = jax.block_until_ready(out)

    ref = basic_block_reference(x, w1, bn1, w2, bn2)
    assert out.shape == (N, C, H, W)
    assert jnp.allclose(out, ref, rtol=1e-4, atol=1e-4), \
        f"max abs diff {jnp.max(jnp.abs(out - ref))}"

    print("KERNEL_OK")
</pallas_src>

<mosaic_0001>
module attributes {stable_mosaic.version = 11 : i64} {
  func.func @basic_block_kernel(%arg0: i32, %arg1: memref<8x512xf32, #tpu.memory_space<vmem>>, %arg2: memref<8x72xf32, #tpu.memory_space<vmem>>, %arg3: memref<8x1xf32, #tpu.memory_space<vmem>>, %arg4: memref<8x72xf32, #tpu.memory_space<vmem>>, %arg5: memref<8x1xf32, #tpu.memory_space<vmem>>, %arg6: memref<8x512xf32, #tpu.memory_space<vmem>>, %arg7: memref<72x512xf32, #tpu.memory_space<vmem>>) attributes {dimension_semantics = [#tpu.dimension_semantics<parallel>], iteration_bounds = array<i64: 1>, scalar_prefetch = 0 : i64, scratch_operands = 1 : i64, tpu.core_type = #tpu.core_type<tc>, window_params = [{transform_indices = @transform_0, window_bounds = array<i64: 8, 512>}, {pipeline_mode = #tpu.pipeline_mode<synchronous>, transform_indices = @transform_1, window_bounds = array<i64: 8, 72>}, {pipeline_mode = #tpu.pipeline_mode<synchronous>, transform_indices = @transform_2, window_bounds = array<i64: 8, 1>}, {pipeline_mode = #tpu.pipeline_mode<synchronous>, transform_indices = @transform_3, window_bounds = array<i64: 8, 72>}, {pipeline_mode = #tpu.pipeline_mode<synchronous>, transform_indices = @transform_4, window_bounds = array<i64: 8, 1>}, {transform_indices = @transform_5, window_bounds = array<i64: 8, 512>}]} {
    %c0 = arith.constant 0 : index
    %c0_0 = arith.constant 0 : index
    %0 = vector.load %arg1[%c0, %c0_0] : memref<8x512xf32, #tpu.memory_space<vmem>>, vector<8x512xf32>
    %1 = tpu.iota {dimensions = array<i32: 1>} : vector<1x512xi32>
    %c255_i32 = arith.constant 255 : i32
    %2 = vector.broadcast %c255_i32 : i32 to vector<1x512xi32>
    %3 = arith.andi %1, %2 : vector<1x512xi32>
    %c4_i32 = arith.constant 4 : i32
    %4 = vector.broadcast %c4_i32 : i32 to vector<1x512xi32>
    %5 = arith.shrsi %3, %4 : vector<1x512xi32>
    %c15_i32 = arith.constant 15 : i32
    %6 = vector.broadcast %c15_i32 : i32 to vector<1x512xi32>
    %7 = arith.andi %3, %6 : vector<1x512xi32>
    %c1_i32 = arith.constant 1 : i32
    %8 = vector.broadcast %c1_i32 : i32 to vector<1x512xi32>
    %9 = arith.cmpi sge, %5, %8 : vector<1x512xi32>
    %c15_i32_1 = arith.constant 15 : i32
    %10 = vector.broadcast %c15_i32_1 : i32 to vector<1x512xi32>
    %11 = arith.cmpi slt, %5, %10 : vector<1x512xi32>
    %c1_i32_2 = arith.constant 1 : i32
    %12 = vector.broadcast %c1_i32_2 : i32 to vector<1x512xi32>
    %13 = arith.cmpi sge, %7, %12 : vector<1x512xi32>
    %c15_i32_3 = arith.constant 15 : i32
    %14 = vector.broadcast %c15_i32_3 : i32 to vector<1x512xi32>
    %15 = arith.cmpi slt, %7, %14 : vector<1x512xi32>
    %c17_i32 = arith.constant 17 : i32
    %16 = tpu.dynamic_rotate %0 by %c17_i32 dim 1 : vector<8x512xf32>, i32 -> vector<8x512xf32>
    %17 = arith.andi %9, %13 : vector<1x512xi1>
    %cst = arith.constant 0.000000e+00 : f32
    %18 = vector.shape_cast %17 : vector<1x512xi1> to vector<1x512xi1>
    %19 = vector.broadcast %18 : vector<1x512xi1> to vector<8x512xi1>
    %20 = vector.broadcast %cst : f32 to vector<8x512xf32>
    %21 = arith.select %19, %16, %20 : vector<8x512xi1>, vector<8x512xf32>
    %c0_4 = arith.constant 0 : index
    %c0_5 = arith.constant 0 : index
    %22 = vector.load %arg7[%c0_4, %c0_5] : memref<72x512xf32, #tpu.memory_space<vmem>>, vector<8x512xf32>
    tpu.vector_store %arg7[%c0_4, %c0_5], %21 {strides = array<i32>} : memref<72x512xf32, #tpu.memory_space<vmem>>, vector<8x512xf32>,
    %c16_i32 = arith.constant 16 : i32
    %23 = tpu.dynamic_rotate %0 by %c16_i32 dim 1 : vector<8x512xf32>, i32 -> vector<8x512xf32>
    %cst_6 = arith.constant 0.000000e+00 : f32
    %24 = vector.shape_cast %9 : vector<1x512xi1> to vector<1x512xi1>
    %25 = vector.broadcast %24 : vector<1x512xi1> to vector<8x512xi1>
    %26 = vector.broadcast %cst_6 : f32 to vector<8x512xf32>
    %27 = arith.select %25, %23, %26 : vector<8x512xi1>, vector<8x512xf32>
    %c8 = arith.constant 8 : index
    %c0_7 = arith.constant 0 : index
    %28 = vector.load %arg7[%c8, %c0_7] : memref<72x512xf32, #tpu.memory_space<vmem>>, vector<8x512xf32>
    tpu.vector_store %arg7[%c8, %c0_7], %27 {strides = array<i32>} : memref<72x512xf32, #tpu.memory_space<vmem>>, vector<8x512xf32>,
    %c15_i32_8 = arith.constant 15 : i32
    %29 = tpu.dynamic_rotate %0 by %c15_i32_8 dim 1 : vector<8x512xf32>, i32 -> vector<8x512xf32>
    %30 = arith.andi %9, %15 : vector<1x512xi1>
    %cst_9 = arith.constant 0.000000e+00 : f32
    %31 = vector.shape_cast %30 : vector<1x512xi1> to vector<1x512xi1>
    %32 = vector.broadcast %31 : vector<1x512xi1> to vector<8x512xi1>
    %33 = vector.broadcast %cst_9 : f32 to vector<8x512xf32>
    %34 = arith.select %32, %29, %33 : vector<8x512xi1>, vector<8x512xf32>
    %c16 = arith.constant 16 : index
    %c0_10 = arith.constant 0 : index
    %35 = vector.load %arg7[%c16, %c0_10] : memref<72x512xf32, #tpu.memory_space<vmem>>, vector<8x512xf32>
    tpu.vector_store %arg7[%c16, %c0_10], %34 {strides = array<i32>} : memref<72x512xf32, #tpu.memory_space<vmem>>, vector<8x512xf32>,
    %c1_i32_11 = arith.constant 1 : i32
    %36 = tpu.dynamic_rotate %0 by %c1_i32_11 dim 1 : vector<8x512xf32>, i32 -> vector<8x512xf32>
    %cst_12 = arith.constant 0.000000e+00 : f32
    %37 = vector.shape_cast %13 : vector<1x512xi1> to vector<1x512xi1>
    %38 = vector.broadcast %37 : vector<1x512xi1> to vector<8x512xi1>
    %39 = vector.broadcast %cst_12 : f32 to vector<8x512xf32>
    %40 = arith.select %38, %36, %39 : vector<8x512xi1>, vector<8x512xf32>
    %c24 = arith.constant 24 : index
    %c0_13 = arith.constant 0 : index
    %41 = vector.load %arg7[%c24, %c0_13] : memref<72x512xf32, #tpu.memory_space<vmem>>, vector<8x512xf32>
    tpu.vector_store %arg7[%c24, %c0_13], %40 {strides = array<i32>} : memref<72x512xf32, #tpu.memory_space<vmem>>, vector<8x512xf32>,
    %c32 = arith.constant 32 : index
    %c0_14 = arith.constant 0 : index
    %42 = vector.load %arg7[%c32, %c0_14] : memref<72x512xf32, #tpu.memory_space<vmem>>, vector<8x512xf32>
    tpu.vector_store %arg7[%c32, %c0_14], %0 {strides = array<i32>} : memref<72x512xf32, #tpu.memory_space<vmem>>, vector<8x512xf32>,
    %c511_i32 = arith.constant 511 : i32
    %43 = tpu.dynamic_rotate %0 by %c511_i32 dim 1 : vector<8x512xf32>, i32 -> vector<8x512xf32>
    %cst_15 = arith.constant 0.000000e+00 : f32
    %44 = vector.shape_cast %15 : vector<1x512xi1> to vector<1x512xi1>
    %45 = vector.broadcast %44 : vector<1x512xi1> to vector<8x512xi1>
    %46 = vector.broadcast %cst_15 : f32 to vector<8x512xf32>
    %47 = arith.select %45, %43, %46 : vector<8x512xi1>, vector<8x512xf32>
    %c40 = arith.constant 40 : index
    %c0_16 = arith.constant 0 : index
    %48 = vector.load %arg7[%c40, %c0_16] : memref<72x512xf32, #tpu.memory_space<vmem>>, vector<8x512xf32>
    tpu.vector_store %arg7[%c40, %c0_16], %47 {strides = array<i32>} : memref<72x512xf32, #tpu.memory_space<vmem>>, vector<8x512xf32>,
    %c497_i32 = arith.constant 497 : i32
    %49 = tpu.dynamic_rotate %0 by %c497_i32 dim 1 : vector<8x512xf32>, i32 -> vector<8x512xf32>
    %50 = arith.andi %11, %13 : vector<1x512xi1>
    %cst_17 = arith.constant 0.000000e+00 : f32
    %51 = vector.shape_cast %50 : vector<1x512xi1> to vector<1x512xi1>
    %52 = vector.broadcast %51 : vector<1x512xi1> to vector<8x512xi1>
    %53 = vector.broadcast %cst_17 : f32 to vector<8x512xf32>
    %54 = arith.select %52, %49, %53 : vector<8x512xi1>, vector<8x512xf32>
    %c48 = arith.constant 48 : index
    %c0_18 = arith.constant 0 : index
    %55 = vector.load %arg7[%c48, %c0_18] : memref<72x512xf32, #tpu.memory_space<vmem>>, vector<8x512xf32>
    tpu.vector_store %arg7[%c48, %c0_18], %54 {strides = array<i32>} : memref<72x512xf32, #tpu.memory_space<vmem>>, vector<8x512xf32>,
    %c496_i32 = arith.constant 496 : i32
    %56 = tpu.dynamic_rotate %0 by %c496_i32 dim 1 : vector<8x512xf32>, i32 -> vector<8x512xf32>
    %cst_19 = arith.constant 0.000000e+00 : f32
    %57 = vector.shape_cast %11 : vector<1x512xi1> to vector<1x512xi1>
    %58 = vector.broadcast %57 : vector<1x512xi1> to vector<8x512xi1>
    %59 = vector.broadcast %cst_19 : f32 to vector<8x512xf32>
    %60 = arith.select %58, %56, %59 : vector<8x512xi1>, vector<8x512xf32>
    %c56 = arith.constant 56 : index
    %c0_20 = arith.constant 0 : index
    %61 = vector.load %arg7[%c56, %c0_20] : memref<72x512xf32, #tpu.memory_space<vmem>>, vector<8x512xf32>
    tpu.vector_store %arg7[%c56, %c0_20], %60 {strides = array<i32>} : memref<72x512xf32, #tpu.memory_space<vmem>>, vector<8x512xf32>,
    %c495_i32 = arith.constant 495 : i32
    %62 = tpu.dynamic_rotate %0 by %c495_i32 dim 1 : vector<8x512xf32>, i32 -> vector<8x512xf32>
    %63 = arith.andi %11, %15 : vector<1x512xi1>
    %cst_21 = arith.constant 0.000000e+00 : f32
    %64 = vector.shape_cast %63 : vector<1x512xi1> to vector<1x512xi1>
    %65 = vector.broadcast %64 : vector<1x512xi1> to vector<8x512xi1>
    %66 = vector.broadcast %cst_21 : f32 to vector<8x512xf32>
    %67 = arith.select %65, %62, %66 : vector<8x512xi1>, vector<8x512xf32>
    %c64 = arith.constant 64 : index
    %c0_22 = arith.constant 0 : index
    %68 = vector.load %arg7[%c64, %c0_22] : memref<72x512xf32, #tpu.memory_space<vmem>>, vector<8x512xf32>
    tpu.vector_store %arg7[%c64, %c0_22], %67 {strides = array<i32>} : memref<72x512xf32, #tpu.memory_space<vmem>>, vector<8x512xf32>,
    %c0_23 = arith.constant 0 : index
    %c0_24 = arith.constant 0 : index
    %69 = vector.load %arg2[%c0_23, %c0_24] : memref<8x72xf32, #tpu.memory_space<vmem>>, vector<8x72xf32>
    %c0_25 = arith.constant 0 : index
    %c0_26 = arith.constant 0 : index
    %70 = vector.load %arg7[%c0_25, %c0_26] : memref<72x512xf32, #tpu.memory_space<vmem>>, vector<72x512xf32>
    %cst_27 = arith.constant dense<0.000000e+00> : vector<8x512xf32>
    %71 = tpu.matmul %69, %70, %cst_27 {dimension_numbers = #tpu.dot_dimension_numbers<[1], [0], [0], [1], [0, 0, 1, 1], [], []>} : vector<8x72xf32>, vector<72x512xf32>, vector<8x512xf32> -> vector<8x512xf32>
    %c0_28 = arith.constant 0 : index
    %c0_29 = arith.constant 0 : index
    %72 = vector.load %arg3[%c0_28, %c0_29] : memref<8x1xf32, #tpu.memory_space<vmem>>, vector<8x1xf32>
    %73 = vector.broadcast %72 : vector<8x1xf32> to vector<8x512xf32>
    %74 = arith.addf %71, %73 : vector<8x512xf32>
    %cst_30 = arith.constant 0.000000e+00 : f32
    %75 = vector.broadcast %cst_30 : f32 to vector<8x512xf32>
    %76 = arith.maximumf %74, %75 : vector<8x512xf32>
    %c17_i32_31 = arith.constant 17 : i32
    %77 = tpu.dynamic_rotate %76 by %c17_i32_31 dim 1 : vector<8x512xf32>, i32 -> vector<8x512xf32>
    %78 = arith.andi %9, %13 : vector<1x512xi1>
    %cst_32 = arith.constant 0.000000e+00 : f32
    %79 = vector.shape_cast %78 : vector<1x512xi1> to vector<1x512xi1>
    %80 = vector.broadcast %79 : vector<1x512xi1> to vector<8x512xi1>
    %81 = vector.broadcast %cst_32 : f32 to vector<8x512xf32>
    %82 = arith.select %80, %77, %81 : vector<8x512xi1>, vector<8x512xf32>
    %c0_33 = arith.constant 0 : index
    %c0_34 = arith.constant 0 : index
    %83 = vector.load %arg7[%c0_33, %c0_34] : memref<72x512xf32, #tpu.memory_space<vmem>>, vector<8x512xf32>
    tpu.vector_store %arg7[%c0_33, %c0_34], %82 {strides = array<i32>} : memref<72x512xf32, #tpu.memory_space<vmem>>, vector<8x512xf32>,
    %c16_i32_35 = arith.constant 16 : i32
    %84 = tpu.dynamic_rotate %76 by %c16_i32_35 dim 1 : vector<8x512xf32>, i32 -> vector<8x512xf32>
    %cst_36 = arith.constant 0.000000e+00 : f32
    %85 = vector.shape_cast %9 : vector<1x512xi1> to vector<1x512xi1>
    %86 = vector.broadcast %85 : vector<1x512xi1> to vector<8x512xi1>
    %87 = vector.broadcast %cst_36 : f32 to vector<8x512xf32>
    %88 = arith.select %86, %84, %87 : vector<8x512xi1>, vector<8x512xf32>
    %c8_37 = arith.constant 8 : index
    %c0_38 = arith.constant 0 : index
    %89 = vector.load %arg7[%c8_37, %c0_38] : memref<72x512xf32, #tpu.memory_space<vmem>>, vector<8x512xf32>
    tpu.vector_store %arg7[%c8_37, %c0_38], %88 {strides = array<i32>} : memref<72x512xf32, #tpu.memory_space<vmem>>, vector<8x512xf32>,
    %c15_i32_39 = arith.constant 15 : i32
    %90 = tpu.dynamic_rotate %76 by %c15_i32_39 dim 1 : vector<8x512xf32>, i32 -> vector<8x512xf32>
    %91 = arith.andi %9, %15 : vector<1x512xi1>
    %cst_40 = arith.constant 0.000000e+00 : f32
    %92 = vector.shape_cast %91 : vector<1x512xi1> to vector<1x512xi1>
    %93 = vector.broadcast %92 : vector<1x512xi1> to vector<8x512xi1>
    %94 = vector.broadcast %cst_40 : f32 to vector<8x512xf32>
    %95 = arith.select %93, %90, %94 : vector<8x512xi1>, vector<8x512xf32>
    %c16_41 = arith.constant 16 : index
    %c0_42 = arith.constant 0 : index
    %96 = vector.load %arg7[%c16_41, %c0_42] : memref<72x512xf32, #tpu.memory_space<vmem>>, vector<8x512xf32>
    tpu.vector_store %arg7[%c16_41, %c0_42], %95 {strides = array<i32>} : memref<72x512xf32, #tpu.memory_space<vmem>>, vector<8x512xf32>,
    %c1_i32_43 = arith.constant 1 : i32
    %97 = tpu.dynamic_rotate %76 by %c1_i32_43 dim 1 : vector<8x512xf32>, i32 -> vector<8x512xf32>
    %cst_44 = arith.constant 0.000000e+00 : f32
    %98 = vector.shape_cast %13 : vector<1x512xi1> to vector<1x512xi1>
    %99 = vector.broadcast %98 : vector<1x512xi1> to vector<8x512xi1>
    %100 = vector.broadcast %cst_44 : f32 to vector<8x512xf32>
    %101 = arith.select %99, %97, %100 : vector<8x512xi1>, vector<8x512xf32>
    %c24_45 = arith.constant 24 : index
    %c0_46 = arith.constant 0 : index
    %102 = vector.load %arg7[%c24_45, %c0_46] : memref<72x512xf32, #tpu.memory_space<vmem>>, vector<8x512xf32>
    tpu.vector_store %arg7[%c24_45, %c0_46], %101 {strides = array<i32>} : memref<72x512xf32, #tpu.memory_space<vmem>>, vector<8x512xf32>,
    %c32_47 = arith.constant 32 : index
    %c0_48 = arith.constant 0 : index
    %103 = vector.load %arg7[%c32_47, %c0_48] : memref<72x512xf32, #tpu.memory_space<vmem>>, vector<8x512xf32>
    tpu.vector_store %arg7[%c32_47, %c0_48], %76 {strides = array<i32>} : memref<72x512xf32, #tpu.memory_space<vmem>>, vector<8x512xf32>,
    %c511_i32_49 = arith.constant 511 : i32
    %104 = tpu.dynamic_rotate %76 by %c511_i32_49 dim 1 : vector<8x512xf32>, i32 -> vector<8x512xf32>
    %cst_50 = arith.constant 0.000000e+00 : f32
    %105 = vector.shape_cast %15 : vector<1x512xi1> to vector<1x512xi1>
    %106 = vector.broadcast %105 : vector<1x512xi1> to vector<8x512xi1>
    %107 = vector.broadcast %cst_50 : f32 to vector<8x512xf32>
    %108 = arith.select %106, %104, %107 : vector<8x512xi1>, vector<8x512xf32>
    %c40_51 = arith.constant 40 : index
    %c0_52 = arith.constant 0 : index
    %109 = vector.load %arg7[%c40_51, %c0_52] : memref<72x512xf32, #tpu.memory_space<vmem>>, vector<8x512xf32>
    tpu.vector_store %arg7[%c40_51, %c0_52], %108 {strides = array<i32>} : memref<72x512xf32, #tpu.memory_space<vmem>>, vector<8x512xf32>,
    %c497_i32_53 = arith.constant 497 : i32
    %110 = tpu.dynamic_rotate %76 by %c497_i32_53 dim 1 : vector<8x512xf32>, i32 -> vector<8x512xf32>
    %111 = arith.andi %11, %13 : vector<1x512xi1>
    %cst_54 = arith.constant 0.000000e+00 : f32
    %112 = vector.shape_cast %111 : vector<1x512xi1> to vector<1x512xi1>
    %113 = vector.broadcast %112 : vector<1x512xi1> to vector<8x512xi1>
    %114 = vector.broadcast %cst_54 : f32 to vector<8x512xf32>
    %115 = arith.select %113, %110, %114 : vector<8x512xi1>, vector<8x512xf32>
    %c48_55 = arith.constant 48 : index
    %c0_56 = arith.constant 0 : index
    %116 = vector.load %arg7[%c48_55, %c0_56] : memref<72x512xf32, #tpu.memory_space<vmem>>, vector<8x512xf32>
    tpu.vector_store %arg7[%c48_55, %c0_56], %115 {strides = array<i32>} : memref<72x512xf32, #tpu.memory_space<vmem>>, vector<8x512xf32>,
    %c496_i32_57 = arith.constant 496 : i32
    %117 = tpu.dynamic_rotate %76 by %c496_i32_57 dim 1 : vector<8x512xf32>, i32 -> vector<8x512xf32>
    %cst_58 = arith.constant 0.000000e+00 : f32
    %118 = vector.shape_cast %11 : vector<1x512xi1> to vector<1x512xi1>
    %119 = vector.broadcast %118 : vector<1x512xi1> to vector<8x512xi1>
    %120 = vector.broadcast %cst_58 : f32 to vector<8x512xf32>
    %121 = arith.select %119, %117, %120 : vector<8x512xi1>, vector<8x512xf32>
    %c56_59 = arith.constant 56 : index
    %c0_60 = arith.constant 0 : index
    %122 = vector.load %arg7[%c56_59, %c0_60] : memref<72x512xf32, #tpu.memory_space<vmem>>, vector<8x512xf32>
    tpu.vector_store %arg7[%c56_59, %c0_60], %121 {strides = array<i32>} : memref<72x512xf32, #tpu.memory_space<vmem>>, vector<8x512xf32>,
    %c495_i32_61 = arith.constant 495 : i32
    %123 = tpu.dynamic_rotate %76 by %c495_i32_61 dim 1 : vector<8x512xf32>, i32 -> vector<8x512xf32>
    %124 = arith.andi %11, %15 : vector<1x512xi1>
    %cst_62 = arith.constant 0.000000e+00 : f32
    %125 = vector.shape_cast %124 : vector<1x512xi1> to vector<1x512xi1>
    %126 = vector.broadcast %125 : vector<1x512xi1> to vector<8x512xi1>
    %127 = vector.broadcast %cst_62 : f32 to vector<8x512xf32>
    %128 = arith.select %126, %123, %127 : vector<8x512xi1>, vector<8x512xf32>
    %c64_63 = arith.constant 64 : index
    %c0_64 = arith.constant 0 : index
    %129 = vector.load %arg7[%c64_63, %c0_64] : memref<72x512xf32, #tpu.memory_space<vmem>>, vector<8x512xf32>
    tpu.vector_store %arg7[%c64_63, %c0_64], %128 {strides = array<i32>} : memref<72x512xf32, #tpu.memory_space<vmem>>, vector<8x512xf32>,
    %c0_65 = arith.constant 0 : index
    %c0_66 = arith.constant 0 : index
    %130 = vector.load %arg4[%c0_65, %c0_66] : memref<8x72xf32, #tpu.memory_space<vmem>>, vector<8x72xf32>
    %c0_67 = arith.constant 0 : index
    %c0_68 = arith.constant 0 : index
    %131 = vector.load %arg7[%c0_67, %c0_68] : memref<72x512xf32, #tpu.memory_space<vmem>>, vector<72x512xf32>
    %cst_69 = arith.constant dense<0.000000e+00> : vector<8x512xf32>
    %132 = tpu.matmul %130, %131, %cst_69 {dimension_numbers = #tpu.dot_dimension_numbers<[1], [0], [0], [1], [0, 0, 1, 1], [], []>} : vector<8x72xf32>, vector<72x512xf32>, vector<8x512xf32> -> vector<8x512xf32>
    %c0_70 = arith.constant 0 : index
    %c0_71 = arith.constant 0 : index
    %133 = vector.load %arg5[%c0_70, %c0_71] : memref<8x1xf32, #tpu.memory_space<vmem>>, vector<8x1xf32>
    %134 = vector.broadcast %133 : vector<8x1xf32> to vector<8x512xf32>
    %135 = arith.addf %132, %134 : vector<8x512xf32>
    %136 = arith.addf %135, %0 : vector<8x512xf32>
    %cst_72 = arith.constant 0.000000e+00 : f32
    %137 = vector.broadcast %cst_72 : f32 to vector<8x512xf32>
    %138 = arith.maximumf %136, %137 : vector<8x512xf32>
    %c0_73 = arith.constant 0 : index
    %c0_74 = arith.constant 0 : index
    %139 = vector.load %arg6[%c0_73, %c0_74] : memref<8x512xf32, #tpu.memory_space<vmem>>, vector<8x512xf32>
    tpu.vector_store %arg6[%c0_73, %c0_74], %138 {strides = array<i32>} : memref<8x512xf32, #tpu.memory_space<vmem>>, vector<8x512xf32>,
    return
  }
  func.func @transform_0(%arg0: i32) -> (i32, i32) {
    %c0_i32 = arith.constant 0 : i32
    %c0_i32_0 = arith.constant 0 : i32
    return %c0_i32, %arg0 : i32, i32
  }
  func.func @transform_1(%arg0: i32) -> (i32, i32) {
    %c0_i32 = arith.constant 0 : i32
    %c0_i32_0 = arith.constant 0 : i32
    %c0_i32_1 = arith.constant 0 : i32
    return %c0_i32, %c0_i32_0 : i32, i32
  }
  func.func @transform_2(%arg0: i32) -> (i32, i32) {
    %c0_i32 = arith.constant 0 : i32
    %c0_i32_0 = arith.constant 0 : i32
    %c0_i32_1 = arith.constant 0 : i32
    return %c0_i32, %c0_i32_0 : i32, i32
  }
  func.func @transform_3(%arg0: i32) -> (i32, i32) {
    %c0_i32 = arith.constant 0 : i32
    %c0_i32_0 = arith.constant 0 : i32
    %c0_i32_1 = arith.constant 0 : i32
    return %c0_i32, %c0_i32_0 : i32, i32
  }
  func.func @transform_4(%arg0: i32) -> (i32, i32) {
    %c0_i32 = arith.constant 0 : i32
    %c0_i32_0 = arith.constant 0 : i32
    %c0_i32_1 = arith.constant 0 : i32
    return %c0_i32, %c0_i32_0 : i32, i32
  }
  func.func @transform_5(%arg0: i32) -> (i32, i32) {
    %c0_i32 = arith.constant 0 : i32
    %c0_i32_0 = arith.constant 0 : i32
    return %c0_i32, %arg0 : i32, i32
  }
}

</mosaic_0001>

<bundles_post_ra>
// kernel: tpu_custom_call.1
= control target key start
LH: loop header
LB: loop body
LE: loop exit
PB: predicated region body
PF: predicated region fallthrough
CT: control target
= control target key end

     0   :  { %10 = vsyncpa [#allocation4], 0  ;;  %s1673_s0 = inlined_call_operand.hbm [shape: f32[8,512], index: 0, kind: input, shape index: {}]   ;;  %s1674_s1 = inlined_call_operand.vmem [shape: f32[8,72], index: 1, kind: input, shape index: {}]   ;;  %s1675_s2 = inlined_call_operand.vmem [shape: f32[8,1], index: 2, kind: input, shape index: {}]   ;;  %s1676_s3 = inlined_call_operand.vmem [shape: f32[8,72], index: 3, kind: input, shape index: {}]   ;;  %s1677_s4 = inlined_call_operand.vmem [shape: f32[8,1], index: 4, kind: input, shape index: {}]   ;;  %s1678_s5 = inlined_call_operand.hbm [shape: f32[8,512], index: 5, kind: output, shape index: {}]  }
   0x1   :  { %11 = vsyncpa [#allocation5], 0  ;;  %s1019_s18 = smov [#allocation3]  }
   0x2   :  { %s18_s19 = sshll.u32 %s1019_s18, 4  ;;  %s19_s19 = int_to_ptr.vmem [resolvable:$true] %s18_s19 }
   0x3   :  { %s983_s20 = scalar_lea.vmem %s19_s19, 512  ;;  %p988_p1 = scmp.lt.s32.totalorder %s19_s19, %s19_s19 }
   0x4   :  { %p984_p0 = scmp.ne.s32.totalorder %s19_s19, %s983_s20  ;;  %p989_p2 = scmp.lt.s32.totalorder %s983_s20, %s983_s20 }
   0x6   :  { %p990_p3 = por %p989_p2, %p988_p1 }
   0x8   :  { %p991_p4 = pnand %p990_p3, %p984_p0 }
   0xa   :  { %994 = shalt.err (!%p991_p4)
}
   0xb   :  { %21 = dma.hbm_to_vmem [thread:$0]  %s1673_s0, 512, %s19_s19, [#allocation4]  }
   0xc   :  { %1015 = dma.done.wait [#allocation4], 512  }
   0xd   :  { %1016 = vsyncadd [#allocation4], 4294966784  ;;  %v1064_v0 = vld [vmem:[#allocation3 + $0x10] sm:$0xff]  ;;  %v1066_v1 = vld [vmem:[#allocation3] sm:$0xff]  ;;  %s1020_s23 = smov 111   ;;  %s1021_s0 = smov 112   ;;  %v37_v7 = vlaneseq }
   0xe   :  { %293 = vrot.lane.b32.xlu1 %v1064_v0, %s1020_s23  ;;  %289 = vrot.lane.b32.xlu0 %v1066_v1, %s1020_s23  ;;  %v1072_v2 = vld [vmem:[#allocation3 + $0x18] sm:$0xff]  ;;  %v1074_v3 = vld [vmem:[#allocation3 + $0x8] sm:$0xff]  ;;  %s1022_s24 = smov 113   ;;  %s1023_s25 = smov 127   ;;  %v1027_v4 = vmov 0.0   ;;  %v1028_v5 = vmov 0  }
   0xf   :  { %s1024_s26 = smov 1   ;;  %s1025_s27 = smov 15   ;;  %433 = vmatprep.mubr.f32.mxu0 %v1027_v4  ;;  %504 = vmatprep.mubr.f32.mxu1 %v1027_v4  ;;  %v359_v6 = vld [vmem:[%s1675_s2] sm:$0xff]  ;;  %v1141_v8 = vand.u32 127, %v37_v7  ;;  %v1723_v51 = vmov 0 }
  0x10   :  { %s1026_s28 = smov 16   ;;  %974 = vset.pattern.permute.xlu0 %v1028_v5  ;;  %s1029_s29 = smov 17  }
  0x11   :  { %v39_v9 = vadd.s32 128, %v1141_v8  ;;  %v41_v10 = vadd.s32 384, %v1141_v8  ;;  %v40_v11 = vadd.s32 256, %v1141_v8  ;;  %v42_v12 = vand.u32 255, %v1141_v8 }
  0x12   :  { %295 = vrot.lane.b32.xlu1 %v1072_v2, %s1020_s23  ;;  %291 = vrot.lane.b32.xlu0 %v1074_v3, %s1020_s23  ;;  %vm1680_vm9 = vcmp.lt.s32.totalorder %v1141_v8, 111  ;;  %vm1679_vm13 = vcmp.lt.s32.totalorder %v1141_v8, 112 }
  0x13   :  { %v43_v13 = vand.u32 255, %v39_v9  ;;  %v45_v14 = vand.u32 255, %v41_v10  ;;  %v44_v15 = vand.u32 255, %v40_v11  ;;  %v1147_v16 = vshra.s32 %v42_v12, 4 }
  0x14   :  { %v1149_v17 = vand.u32 15, %v42_v12 }
  0x15   :  { %v1151_v18 = vshra.s32 %v43_v13, 4  ;;  %v1153_v19 = vand.u32 15, %v43_v13  ;;  %v1155_v20 = vshra.s32 %v45_v14, 4  ;;  %v1157_v21 = vand.u32 15, %v45_v14 }
  0x16   :  { %262 = vrot.lane.b32.xlu1 %v1074_v3, %s1021_s0  ;;  %260 = vrot.lane.b32.xlu0 %v1066_v1, %s1021_s0  ;;  %v1159_v22 = vshra.s32 %v44_v15, 4  ;;  %v1161_v23 = vand.u32 15, %v44_v15  ;;  %vm1688_vm0 = vcmp.lt.s32.totalorder %v1147_v16, 15  ;;  %vm1682_vm1 = vcmp.lt.s32.totalorder %v1149_v17, 15 }
  0x17   :  { %vm1684_vm2 = vcmp.lt.s32.totalorder %v1151_v18, 15  ;;  %vm1695_vm3 = vcmp.lt.s32.totalorder %v1153_v19, 15  ;;  %vm1685_vm4 = vcmp.lt.s32.totalorder %v1155_v20, 15  ;;  %vm1683_vm5 = vcmp.lt.s32.totalorder %v1157_v21, 15  ;;  %vm1173_vm6 = vmand %vm1688_vm0, %vm1682_vm1 }
  0x18   :  { %vm1686_vm7 = vcmp.lt.s32.totalorder %v1159_v22, 15  ;;  %vm1681_vm8 = vcmp.lt.s32.totalorder %v1161_v23, 15  ;;  %vm1184_vm10 = vmand %vm1684_vm2, %vm1695_vm3  ;;  %vm1692_vm14 = vcmp.ge.s32.totalorder %v1153_v19, 1  ;;  %vm1690_vm15 = vcmp.ge.s32.totalorder %v1157_v21, 1 }
  0x19   :  { %vm1192_vm11 = vmand %vm1685_vm4, %vm1683_vm5  ;;  %vm1687_vm5 = vcmp.lt.s32.totalorder %v1141_v8, 113  ;;  %v1730_v14 = vmov 0 }
  0x1a   :  { %266 = vrot.lane.b32.xlu1 %v1072_v2, %s1021_s0  ;;  %264 = vrot.lane.b32.xlu0 %v1064_v0, %s1021_s0  ;;  %vm1200_vm12 = vmand %vm1686_vm7, %vm1681_vm8  ;;  %vm1689_vm8 = vcmp.ge.s32.totalorder %v1161_v23, 1 }
  0x1b   :  { %vm1253_vm1 = vmand %vm1685_vm4, %vm1690_vm15  ;;  %vm1727_vm15 = vcmp.lt.s32.totalorder %v1161_v23, 15 }
  0x1e   :  { %229 = vrot.lane.b32.xlu1 %v1074_v3, %s1022_s24  ;;  %227 = vrot.lane.b32.xlu0 %v1066_v1, %s1022_s24 }
  0x22   :  { %233 = vrot.lane.b32.xlu1 %v1072_v2, %s1022_s24  ;;  %231 = vrot.lane.b32.xlu0 %v1064_v0, %s1022_s24 }
  0x26   :  { %200 = vrot.lane.b32.xlu1 %v1074_v3, %s1023_s25  ;;  %198 = vrot.lane.b32.xlu0 %v1066_v1, %s1023_s25 }
  0x2a   :  { %204 = vrot.lane.b32.xlu1 %v1072_v2, %s1023_s25  ;;  %202 = vrot.lane.b32.xlu0 %v1064_v0, %s1023_s25 }
  0x2e   :  { %167 = vrot.lane.b32.xlu1 %v1074_v3, %s1024_s26  ;;  %165 = vrot.lane.b32.xlu0 %v1066_v1, %s1024_s26 }
  0x32   :  { %171 = vrot.lane.b32.xlu1 %v1072_v2, %s1024_s26  ;;  %169 = vrot.lane.b32.xlu0 %v1064_v0, %s1024_s26 }
  0x36   :  { %134 = vrot.lane.b32.xlu1 %v1074_v3, %s1025_s27  ;;  %132 = vrot.lane.b32.xlu0 %v1066_v1, %s1025_s27 }
  0x3a   :  { %138 = vrot.lane.b32.xlu1 %v1072_v2, %s1025_s27  ;;  %136 = vrot.lane.b32.xlu0 %v1064_v0, %s1025_s27 }
  0x3e   :  { %105 = vrot.lane.b32.xlu1 %v1074_v3, %s1026_s28  ;;  %103 = vrot.lane.b32.xlu0 %v1066_v1, %s1026_s28 }
  0x42   :  { %109 = vrot.lane.b32.xlu1 %v1072_v2, %s1026_s28  ;;  %107 = vrot.lane.b32.xlu0 %v1064_v0, %s1026_s28 }
  0x46   :  { %72 = vrot.lane.b32.xlu1 %v1074_v3, %s1029_s29  ;;  %70 = vrot.lane.b32.xlu0 %v1066_v1, %s1029_s29 }
  0x4a   :  { %76 = vrot.lane.b32.xlu1 %v1072_v2, %s1029_s29  ;;  %74 = vrot.lane.b32.xlu0 %v1064_v0, %s1029_s29 }
  0x4e   :  { %362 = vperm.xlu0 %974, %v359_v6  }
  0x80   :  { %v294_v24 = vpop.permute.xlu1 %293  ;;  %v290_v25 = vpop.permute.xlu0 %289 }
  0x84   :  { %v296_v29 = vpop.permute.xlu1 %295  ;;  %v292_v30 = vpop.permute.xlu0 %291 }
  0x85   :  { %v299_v32 = vsel %vm1680_vm9, %v292_v30, %v294_v24  ;;  %v301_v33 = vsel %vm1680_vm9, %v296_v29, %v290_v25  ;;  %v300_v34 = vsel %vm1680_vm9, %v290_v25, %v292_v30  ;;  %v298_v35 = vsel %vm1680_vm9, %v294_v24, %v296_v29  ;;  %vm1244_vm9 = vmand %vm1684_vm2, %vm1692_vm14 }
  0x86   :  { %898 = vmatprep.subr.msk.mxu0 %vm1184_vm10, %v299_v32  ;;  %914 = vmatprep.subr.msk.mxu1 %vm1192_vm11, %v301_v33  ;;  %v1733_v29 = vmov 0  ;;  %v1736_v30 = vmov 0 }
  0x87   :  { %899 = vmatpush1.msk.msra.mxu0 %vm1173_vm6, %v300_v34  ;;  %915 = vmatpush1.msk.msra.mxu1 %vm1200_vm12, %v298_v35  ;;  %v1739_v34 = vmov 0 }
  0x88   :  { %v263_v36 = vpop.permute.xlu1 %262  ;;  %v261_v37 = vpop.permute.xlu0 %260 }
  0x89   :  { %v271_v43 = vsel %vm1679_vm13, %v261_v37, %v263_v36 }
  0x8c   :  { %v267_v38 = vpop.permute.xlu1 %266  ;;  %v265_v39 = vpop.permute.xlu0 %264 }
  0x8d   :  { %v272_v40 = vsel %vm1679_vm13, %v267_v38, %v261_v37  ;;  %v269_v41 = vsel %vm1679_vm13, %v265_v39, %v267_v38  ;;  %v270_v42 = vsel %vm1679_vm13, %v263_v36, %v265_v39  ;;  %vm1694_vm13 = vcmp.ge.s32.totalorder %v1149_v17, 1 }
  0x8e   :  { %900 = vmatprep.subr.msk.mxu0 %vm1684_vm2, %v270_v42  ;;  %916 = vmatprep.subr.msk.mxu1 %vm1685_vm4, %v272_v40  ;;  %vm1262_vm2 = vmand %vm1688_vm0, %vm1694_vm13 }
  0x8f   :  { %901 = vmatpush1.msk.msra.mxu0 %vm1688_vm0, %v271_v43  ;;  %917 = vmatpush1.msk.msra.mxu1 %vm1686_vm7, %v269_v41  ;;  %vm1270_vm4 = vmand %vm1686_vm7, %vm1689_vm8  ;;  %vm1691_vm7 = vcmp.lt.s32.totalorder %v1141_v8, 127  ;;  %vm1693_vm0 = vcmp.lt.s32.totalorder %v1141_v8, 1  ;;  %vm1726_vm8 = vcmp.lt.s32.totalorder %v1149_v17, 15 }
  0x90   :  { %v230_v44 = vpop.permute.xlu1 %229  ;;  %v228_v45 = vpop.permute.xlu0 %227  ;;  %v1724_v51 = vsel %vm1270_vm4, 4294967295, %v1723_v51 }
  0x91   :  { %v238_v55 = vsel %vm1687_vm5, %v228_v45, %v230_v44 }
  0x94   :  { %v234_v49 = vpop.permute.xlu1 %233  ;;  %v232_v50 = vpop.permute.xlu0 %231 }
  0x95   :  { %v239_v52 = vsel %vm1687_vm5, %v234_v49, %v228_v45  ;;  %v236_v53 = vsel %vm1687_vm5, %v232_v50, %v234_v49  ;;  %v237_v54 = vsel %vm1687_vm5, %v230_v44, %v232_v50  ;;  %vm1725_vm5 = vcmp.lt.s32.totalorder %v1157_v21, 15 }
  0x96   :  { %902 = vmatprep.subr.msk.mxu0 %vm1244_vm9, %v237_v54  ;;  %918 = vmatprep.subr.msk.mxu1 %vm1253_vm1, %v239_v52  ;;  %v1748_v49 = vmov 0 }
  0x97   :  { %903 = vmatpush1.msk.msra.mxu0 %vm1262_vm2, %v238_v55  ;;  %919 = vmatpush1.msk.msra.mxu1 %vm1270_vm4, %v236_v53 }
  0x98   :  { %v201_v56 = vpop.permute.xlu1 %200  ;;  %v199_v57 = vpop.permute.xlu0 %198 }
  0x99   :  { %v209_v63 = vsel %vm1691_vm7, %v199_v57, %v201_v56 }
  0x9c   :  { %v205_v58 = vpop.permute.xlu1 %204  ;;  %v203_v59 = vpop.permute.xlu0 %202 }
  0x9d   :  { %v210_v60 = vsel %vm1691_vm7, %v205_v58, %v199_v57  ;;  %v207_v61 = vsel %vm1691_vm7, %v203_v59, %v205_v58  ;;  %v208_v62 = vsel %vm1691_vm7, %v201_v56, %v203_v59  ;;  %vm1729_vm7 = vcmp.ge.s32.totalorder %v1161_v23, 1  ;;  %v322_v58 = vld [vmem:[%s1674_s1] sm:$0xff] }
  0x9e   :  { %904 = vmatprep.subr.msk.mxu0 %vm1695_vm3, %v208_v62  ;;  %920 = vmatprep.subr.msk.mxu1 %vm1725_vm5, %v210_v60  ;;  %vm1696_vm5 = vcmp.ge.s32.totalorder %v1151_v18, 1 }
  0x9f   :  { %905 = vmatpush1.msk.msra.mxu0 %vm1726_vm8, %v209_v63  ;;  %921 = vmatpush1.msk.msra.mxu1 %vm1727_vm15, %v207_v61  ;;  %vm1728_vm8 = vcmp.ge.s32.totalorder %v1157_v21, 1  ;;  %vm1698_vm15 = vcmp.lt.s32.totalorder %v1141_v8, 15 }
  0xa0   :  { %v168_v5 = vpop.permute.xlu1 %167  ;;  %391 = vmatprep.subr.mxu0 %v1074_v3  ;;  %v166_v6 = vpop.permute.xlu0 %165  ;;  %462 = vmatprep.subr.mxu1 %v1072_v2 }
  0xa1   :  { %v176_v7 = vsel %vm1693_vm0, %v166_v6, %v168_v5  ;;  %392 = vmatpush1.msra.mxu0 %v1066_v1  ;;  %463 = vmatpush1.msra.mxu1 %v1064_v0 }
  0xa2   :  { %906 = vmatprep.subr.msk.mxu0 %vm1692_vm14, %v176_v7  ;;  %vm1334_vm14 = vmand %vm1696_vm5, %vm1695_vm3  ;;  %vm1735_vm5 = vcmp.lt.s32.totalorder %v1157_v21, 15 }
  0xa3   :  { %v1731_v14 = vsel %vm1334_vm14, 4294967295, %v1730_v14 }
  0xa4   :  { %v172_v9 = vpop.permute.xlu1 %171  ;;  %v170_v10 = vpop.permute.xlu0 %169 }
  0xa5   :  { %v177_v11 = vsel %vm1693_vm0, %v172_v9, %v166_v6  ;;  %v174_v12 = vsel %vm1693_vm0, %v170_v10, %v172_v9  ;;  %v175_v13 = vsel %vm1693_vm0, %v168_v5, %v170_v10  ;;  %vm1700_vm0 = vcmp.ge.s32.totalorder %v1147_v16, 1 }
  0xa6   :  { %907 = vmatpush1.msk.msra.mxu0 %vm1694_vm13, %v177_v11  ;;  %922 = vmatprep.subr.msk.mxu1 %vm1728_vm8, %v174_v12  ;;  %vm1707_vm13 = vcmp.ge.s32.totalorder %v1155_v20, 1  ;;  %vm1704_vm8 = vcmp.ge.s32.totalorder %v1159_v22, 1 }
  0xa7   :  { %923 = vmatpush1.msk.msra.mxu1 %vm1729_vm7, %v175_v13  ;;  %vm1732_vm7 = vcmp.lt.s32.totalorder %v1149_v17, 15  ;;  %vm1357_vm4 = vmand %vm1707_vm13, %vm1735_vm5 }
  0xa8   :  { %v135_v15 = vpop.permute.xlu1 %134  ;;  %v133_v24 = vpop.permute.xlu0 %132  ;;  %vm1349_vm3 = vmand %vm1700_vm0, %vm1732_vm7  ;;  %v1737_v30 = vsel %vm1357_vm4, 4294967295, %v1736_v30  ;;  %vm1741_vm7 = vcmp.lt.s32.totalorder %v1141_v8, 15 }
  0xa9   :  { %v143_v25 = vsel %vm1698_vm15, %v133_v24, %v135_v15  ;;  %v1734_v29 = vsel %vm1349_vm3, 4294967295, %v1733_v29  ;;  %vm1738_vm15 = vcmp.lt.s32.totalorder %v1161_v23, 15  ;;  %vm1742_vm0 = vmmov %vm1741_vm7 }
  0xaa   :  { %908 = vmatprep.subr.msk.mxu0 %vm1334_vm14, %v143_v25  ;;  %vm1365_vm14 = vmand %vm1704_vm8, %vm1738_vm15  ;;  %vm1703_vm15 = vcmp.lt.s32.totalorder %v1141_v8, 16 }
  0xab   :  { %v1740_v34 = vsel %vm1365_vm14, 4294967295, %v1739_v34  ;;  %vm1743_vm5 = vmmov %vm1742_vm0 }
  0xac   :  { %v139_v32 = vpop.permute.xlu1 %138  ;;  %v137_v33 = vpop.permute.xlu0 %136 }
  0xad   :  { %v144_v35 = vsel %vm1741_vm7, %v139_v32, %v133_v24  ;;  %v141_v36 = vsel %vm1742_vm0, %v137_v33, %v139_v32  ;;  %v142_v37 = vsel %vm1743_vm5, %v135_v15, %v137_v33  ;;  %vm1744_vm0 = vcmp.ge.s32.totalorder %v1151_v18, 1  ;;  %v716_v32 = vld [vmem:[%s1677_s4] sm:$0xff] }
  0xae   :  { %909 = vmatpush1.msk.msra.mxu0 %vm1349_vm3, %v144_v35  ;;  %924 = vmatprep.subr.msk.mxu1 %vm1357_vm4, %v141_v36  ;;  %vm1745_vm7 = vcmp.ge.s32.totalorder %v1147_v16, 1  ;;  %vm1705_vm5 = vcmp.lt.s32.totalorder %v1141_v8, 17 }
  0xaf   :  { %925 = vmatpush1.msk.msra.mxu1 %vm1365_vm14, %v142_v37  ;;  %vm1747_vm14 = vcmp.ge.s32.totalorder %v1151_v18, 1 }
  0xb0   :  { %v106_v38 = vpop.permute.xlu1 %105  ;;  %v104_v39 = vpop.permute.xlu0 %103 }
  0xb1   :  { %v114_v40 = vsel %vm1703_vm15, %v104_v39, %v106_v38 }
  0xb2   :  { %910 = vmatprep.subr.msk.mxu0 %vm1744_vm0, %v114_v40  ;;  %vm1746_vm0 = vcmp.ge.s32.totalorder %v1153_v19, 1 }
  0xb3   :  { %vm1403_vm4 = vmand %vm1747_vm14, %vm1746_vm0  ;;  %vm1754_vm14 = vcmp.ge.s32.totalorder %v1157_v21, 1 }
  0xb4   :  { %v110_v41 = vpop.permute.xlu1 %109  ;;  %v108_v42 = vpop.permute.xlu0 %107  ;;  %v1749_v49 = vsel %vm1403_vm4, 4294967295, %v1748_v49  ;;  %vm1423_vm0 = vmand %vm1707_vm13, %vm1754_vm14  ;;  %vm1761_vm14 = vcmp.lt.s32.totalorder %v1141_v8, 17 }
  0xb5   :  { %v115_v43 = vsel %vm1703_vm15, %v110_v41, %v104_v39  ;;  %v112_v44 = vsel %vm1703_vm15, %v108_v42, %v110_v41  ;;  %v113_v45 = vsel %vm1703_vm15, %v106_v38, %v108_v42  ;;  %vm1751_vm15 = vcmp.ge.s32.totalorder %v1147_v16, 1 }
  0xb6   :  { %911 = vmatpush1.msk.msra.mxu0 %vm1745_vm7, %v115_v43  ;;  %926 = vmatprep.subr.msk.mxu1 %vm1707_vm13, %v112_v44  ;;  %vm1750_vm7 = vcmp.ge.s32.totalorder %v1149_v17, 1  ;;  %vm1762_vm13 = vmmov %vm1761_vm14 }
  0xb7   :  { %927 = vmatpush1.msk.msra.mxu1 %vm1704_vm8, %v113_v45  ;;  %vm1415_vm8 = vmand %vm1751_vm15, %vm1750_vm7  ;;  %vm1757_vm15 = vcmp.ge.s32.totalorder %v1161_v23, 1  ;;  %vm1758_vm7 = vcmp.ge.s32.totalorder %v1159_v22, 1 }
  0xb8   :  { %v73_v50 = vpop.permute.xlu1 %72  ;;  %v71_v52 = vpop.permute.xlu0 %70  ;;  %vm1763_vm3 = vmmov %vm1762_vm13 }
  0xb9   :  { %v81_v53 = vsel %vm1705_vm5, %v71_v52, %v73_v50  ;;  %vm365_vm5 = vcmask 588800  }
  0xba   :  { %912 = vmatprep.subr.msk.mxu0 %vm1403_vm4, %v81_v53  ;;  %vm1434_vm4 = vmand %vm1758_vm7, %vm1757_vm15 }
  0xbc   :  { %v77_v56 = vpop.permute.xlu1 %76  ;;  %v75_v57 = vpop.permute.xlu0 %74 }
  0xbd   :  { %v82_v60 = vsel %vm1761_vm14, %v77_v56, %v71_v52  ;;  %v79_v61 = vsel %vm1762_vm13, %v75_v57, %v77_v56  ;;  %v80_v62 = vsel %vm1763_vm3, %v73_v50, %v75_v57  ;;  %vm1764_vm3 = vcmp.lt.s32.totalorder %v1141_v8, 111 }
  0xbe   :  { %913 = vmatpush1.msk.msra.mxu0 %vm1415_vm8, %v82_v60  ;;  %928 = vmatprep.subr.msk.mxu1 %vm1423_vm0, %v79_v61  ;;  %vm1765_vm13 = vmmov %vm1764_vm3  ;;  %vm1770_vm14 = vcmp.lt.s32.totalorder %v1151_v18, 15 }
  0xbf   :  { %894 = vmatmul.mubr.msk.f32.vlgmr.msra.gmra.mxu0 %vm365_vm5, %v322_v58  ;;  %929 = vmatpush1.msk.msra.mxu1 %vm1434_vm4, %v80_v62  ;;  %vm1766_vm15 = vmmov %vm1764_vm3 }
  0xc0   :  { %895 = vmatmul.mubr.msk.f32.vlgmr.msra.gmra.mxu1 %vm365_vm5, %v322_v58  ;;  %789 = vmatprep.mubr.f32.mxu0 %v1027_v4  ;;  %vm1767_vm7 = vmmov %vm1764_vm3 }
  0xc1   :  { %860 = vmatprep.mubr.f32.mxu1 %v1027_v4 }
  0xc9   :  { %v363_v63 = vpop.permute.xlu0 %362 }
 0x17f   :  { %v435_v5 = vpop.f32.mrf.mxu0 }
 0x180   :  { %v436_v6 = vadd.f32 %v435_v5, %v363_v63  ;;  %v506_v7 = vpop.f32.mrf.mxu1 }
 0x181   :  { %v507_v9 = vadd.f32 %v506_v7, %v363_v63  ;;  %v437_v10 = vpop.f32.mrf.mxu0 }
 0x182   :  { %v1454_v11 = vmax.f32 %v436_v6, 0.0  ;;  %v438_v12 = vadd.f32 %v437_v10, %v363_v63  ;;  %v508_v15 = vpop.f32.mrf.mxu1 }
 0x183   :  { %v1456_v13 = vmax.f32 %v507_v9, 0.0  ;;  %v509_v4 = vadd.f32 %v508_v15, %v363_v63 }
 0x184   :  { %659 = vrot.lane.b32.xlu1 %v1454_v11, %s1020_s23  ;;  %v1462_v24 = vmax.f32 %v438_v12, 0.0 }
 0x185   :  { %663 = vrot.lane.b32.xlu0 %v1456_v13, %s1020_s23  ;;  %v1468_v25 = vmax.f32 %v509_v4, 0.0 }
 0x188   :  { %661 = vrot.lane.b32.xlu1 %v1462_v24, %s1020_s23 }
 0x189   :  { %639 = vrot.lane.b32.xlu0 %v1454_v11, %s1021_s0 }
 0x18c   :  { %665 = vrot.lane.b32.xlu1 %v1468_v25, %s1020_s23 }
 0x18d   :  { %643 = vrot.lane.b32.xlu0 %v1456_v13, %s1021_s0 }
 0x190   :  { %641 = vrot.lane.b32.xlu1 %v1462_v24, %s1021_s0 }
 0x191   :  { %619 = vrot.lane.b32.xlu0 %v1454_v11, %s1022_s24 }
 0x194   :  { %645 = vrot.lane.b32.xlu1 %v1468_v25, %s1021_s0 }
 0x195   :  { %623 = vrot.lane.b32.xlu0 %v1456_v13, %s1022_s24 }
 0x198   :  { %621 = vrot.lane.b32.xlu1 %v1462_v24, %s1022_s24 }
 0x199   :  { %599 = vrot.lane.b32.xlu0 %v1454_v11, %s1023_s25 }
 0x19c   :  { %625 = vrot.lane.b32.xlu1 %v1468_v25, %s1022_s24 }
 0x19d   :  { %603 = vrot.lane.b32.xlu0 %v1456_v13, %s1023_s25 }
 0x1a0   :  { %601 = vrot.lane.b32.xlu1 %v1462_v24, %s1023_s25 }
 0x1a1   :  { %575 = vrot.lane.b32.xlu0 %v1454_v11, %s1024_s26 }
 0x1a4   :  { %605 = vrot.lane.b32.xlu1 %v1468_v25, %s1023_s25 }
 0x1a5   :  { %579 = vrot.lane.b32.xlu0 %v1456_v13, %s1024_s26 }
 0x1a8   :  { %577 = vrot.lane.b32.xlu1 %v1462_v24, %s1024_s26 }
 0x1a9   :  { %555 = vrot.lane.b32.xlu0 %v1454_v11, %s1025_s27 }
 0x1ac   :  { %581 = vrot.lane.b32.xlu1 %v1468_v25, %s1024_s26 }
 0x1ad   :  { %559 = vrot.lane.b32.xlu0 %v1456_v13, %s1025_s27 }
 0x1b0   :  { %557 = vrot.lane.b32.xlu1 %v1462_v24, %s1025_s27 }
 0x1b1   :  { %535 = vrot.lane.b32.xlu0 %v1454_v11, %s1026_s28 }
 0x1b4   :  { %561 = vrot.lane.b32.xlu1 %v1468_v25, %s1025_s27 }
 0x1b5   :  { %539 = vrot.lane.b32.xlu0 %v1456_v13, %s1026_s28 }
 0x1b8   :  { %537 = vrot.lane.b32.xlu1 %v1462_v24, %s1026_s28 }
 0x1b9   :  { %515 = vrot.lane.b32.xlu0 %v1454_v11, %s1029_s29 }
 0x1bc   :  { %541 = vrot.lane.b32.xlu1 %v1468_v25, %s1026_s28 }
 0x1bd   :  { %519 = vrot.lane.b32.xlu0 %v1456_v13, %s1029_s29 }
 0x1c0   :  { %517 = vrot.lane.b32.xlu1 %v1462_v24, %s1029_s29 }
 0x1c1   :  { %719 = vperm.xlu0 %974, %v716_v32  }
 0x1c4   :  { %521 = vrot.lane.b32.xlu1 %v1468_v25, %s1029_s29 }
 0x1f6   :  { %v660_v33 = vpop.permute.xlu1 %659 }
 0x1f7   :  { %v664_v35 = vpop.permute.xlu0 %663 }
 0x1fa   :  { %v662_v36 = vpop.permute.xlu1 %661 }
 0x1fb   :  { %v668_v37 = vsel %vm1764_vm3, %v662_v36, %v664_v35  ;;  %v669_v38 = vsel %vm1765_vm13, %v660_v33, %v662_v36  ;;  %v640_v39 = vpop.permute.xlu0 %639  ;;  %vm1771_vm3 = vcmp.lt.s32.totalorder %v1147_v16, 15  ;;  %vm1774_vm13 = vcmp.lt.s32.totalorder %v1155_v20, 15 }
 0x1fc   :  { %930 = vmatprep.subr.msk.mxu0 %vm1184_vm10, %v668_v37  ;;  %vm1768_vm10 = vcmp.lt.s32.totalorder %v1141_v8, 112 }
 0x1fd   :  { %931 = vmatpush1.msk.msra.mxu0 %vm1173_vm6, %v669_v38  ;;  %vm1769_vm6 = vmmov %vm1768_vm10 }
 0x1fe   :  { %v666_v40 = vpop.permute.xlu1 %665 }
 0x1ff   :  { %v667_v41 = vsel %vm1766_vm15, %v664_v35, %v666_v40  ;;  %v670_v42 = vsel %vm1767_vm7, %v666_v40, %v660_v33  ;;  %v644_v43 = vpop.permute.xlu0 %643  ;;  %vm1775_vm15 = vcmp.lt.s32.totalorder %v1159_v22, 15  ;;  %vm1776_vm7 = vcmp.lt.s32.totalorder %v1141_v8, 113 }
 0x200   :  { %946 = vmatprep.subr.msk.mxu1 %vm1192_vm11, %v670_v42  ;;  %vm1772_vm11 = vmmov %vm1769_vm6 }
 0x201   :  { %947 = vmatpush1.msk.msra.mxu1 %vm1200_vm12, %v667_v41  ;;  %vm1773_vm12 = vmmov %vm1769_vm6 }
 0x202   :  { %v642_v44 = vpop.permute.xlu1 %641 }
 0x203   :  { %v648_v27 = vsel %vm1768_vm10, %v642_v44, %v644_v43  ;;  %v649_v26 = vsel %vm1769_vm6, %v640_v39, %v642_v44  ;;  %v620_v45 = vpop.permute.xlu0 %619  ;;  %vm1777_vm10 = vmmov %vm1776_vm7 }
 0x204   :  { %932 = vmatprep.subr.msk.mxu0 %vm1770_vm14, %v648_v27  ;;  %vm1778_vm6 = vmmov %vm1776_vm7 }
 0x205   :  { %933 = vmatpush1.msk.msra.mxu0 %vm1771_vm3, %v649_v26  ;;  %vm1779_vm14 = vmmov %vm1778_vm6  ;;  %vm1780_vm3 = vnez %v1724_v51 }
 0x206   :  { %v646_v50 = vpop.permute.xlu1 %645 }
 0x207   :  { %v647_v28 = vsel %vm1772_vm11, %v644_v43, %v646_v50  ;;  %v650_v31 = vsel %vm1773_vm12, %v646_v50, %v640_v39  ;;  %v624_v52 = vpop.permute.xlu0 %623  ;;  %vm1783_vm11 = vcmp.lt.s32.totalorder %v1153_v19, 15  ;;  %vm1784_vm12 = vcmp.lt.s32.totalorder %v1149_v17, 15 }
 0x208   :  { %948 = vmatprep.subr.msk.mxu1 %vm1774_vm13, %v650_v31 }
 0x209   :  { %949 = vmatpush1.msk.msra.mxu1 %vm1775_vm15, %v647_v28  ;;  %vm1787_vm15 = vcmp.lt.s32.totalorder %v1157_v21, 15 }
 0x20a   :  { %v622_v53 = vpop.permute.xlu1 %621 }
 0x20b   :  { %v628_v56 = vsel %vm1776_vm7, %v622_v53, %v624_v52  ;;  %v629_v57 = vsel %vm1777_vm10, %v620_v45, %v622_v53  ;;  %v600_v58 = vpop.permute.xlu0 %599  ;;  %vm1788_vm7 = vcmp.lt.s32.totalorder %v1161_v23, 15  ;;  %vm1789_vm10 = vcmp.lt.s32.totalorder %v1141_v8, 1 }
 0x20c   :  { %934 = vmatprep.subr.msk.mxu0 %vm1244_vm9, %v628_v56  ;;  %vm1781_vm9 = vcmp.lt.s32.totalorder %v1141_v8, 127 }
 0x20d   :  { %935 = vmatpush1.msk.msra.mxu0 %vm1262_vm2, %v629_v57  ;;  %vm1782_vm2 = vmmov %vm1781_vm9 }
 0x20e   :  { %v626_v60 = vpop.permute.xlu1 %625 }
 0x20f   :  { %v627_v61 = vsel %vm1778_vm6, %v624_v52, %v626_v60  ;;  %v630_v62 = vsel %vm1779_vm14, %v626_v60, %v620_v45  ;;  %v604_v63 = vpop.permute.xlu0 %603  ;;  %vm1790_vm6 = vcmp.ge.s32.totalorder %v1153_v19, 1  ;;  %vm1791_vm14 = vmmov %vm1789_vm10 }
 0x210   :  { %950 = vmatprep.subr.msk.mxu1 %vm1253_vm1, %v630_v62  ;;  %vm1785_vm1 = vmmov %vm1782_vm2 }
 0x211   :  { %951 = vmatpush1.msk.msra.mxu1 %vm1780_vm3, %v627_v61  ;;  %vm1786_vm13 = vmmov %vm1785_vm1 }
 0x212   :  { %v602_v5 = vpop.permute.xlu1 %601  ;;  %vm1792_vm3 = vmmov %vm1789_vm10 }
 0x213   :  { %v608_v46 = vsel %vm1781_vm9, %v602_v5, %v604_v63  ;;  %v609_v48 = vsel %vm1782_vm2, %v600_v58, %v602_v5  ;;  %v576_v6 = vpop.permute.xlu0 %575  ;;  %vm1793_vm9 = vmmov %vm1792_vm3  ;;  %vm1794_vm2 = vcmp.ge.s32.totalorder %v1149_v17, 1 }
 0x214   :  { %936 = vmatprep.subr.msk.mxu0 %vm1783_vm11, %v608_v46  ;;  %vm1795_vm11 = vcmp.ge.s32.totalorder %v1157_v21, 1 }
 0x215   :  { %937 = vmatpush1.msk.msra.mxu0 %vm1784_vm12, %v609_v48  ;;  %vm1796_vm12 = vcmp.ge.s32.totalorder %v1161_v23, 1 }
 0x216   :  { %747 = vmatprep.subr.mxu0 %v1462_v24  ;;  %v606_v47 = vpop.permute.xlu1 %605 }
 0x217   :  { %v607_v51 = vsel %vm1785_vm1, %v604_v63, %v606_v47  ;;  %v610_v7 = vsel %vm1786_vm13, %v606_v47, %v600_v58  ;;  %v580_v9 = vpop.permute.xlu0 %579  ;;  %748 = vmatpush1.msra.mxu0 %v1454_v11  ;;  %vm1797_vm1 = vcmp.lt.s32.totalorder %v1141_v8, 15  ;;  %vm1798_vm13 = vnez %v1731_v14 }
 0x218   :  { %952 = vmatprep.subr.msk.mxu1 %vm1787_vm15, %v610_v7  ;;  %vm1799_vm15 = vmmov %vm1797_vm1 }
 0x219   :  { %953 = vmatpush1.msk.msra.mxu1 %vm1788_vm7, %v607_v51  ;;  %vm1800_vm7 = vmmov %vm1797_vm1 }
 0x21a   :  { %818 = vmatprep.subr.mxu1 %v1468_v25  ;;  %v578_v10 = vpop.permute.xlu1 %577 }
 0x21b   :  { %v585_v12 = vsel %vm1789_vm10, %v576_v6, %v578_v10  ;;  %v556_v15 = vpop.permute.xlu0 %555  ;;  %819 = vmatpush1.msra.mxu1 %v1456_v13  ;;  %v584_v25 = vsel %vm1793_vm9, %v578_v10, %v580_v9  ;;  %vm1801_vm10 = vmmov %vm1797_vm1  ;;  %vm1805_vm9 = vcmp.lt.s32.totalorder %v1141_v8, 16 }
 0x21c   :  { %938 = vmatprep.subr.msk.mxu0 %vm1790_vm6, %v585_v12  ;;  %vm1802_vm6 = vnez %v1734_v29 }
 0x21e   :  { %v582_v24 = vpop.permute.xlu1 %581 }
 0x21f   :  { %v583_v11 = vsel %vm1791_vm14, %v580_v9, %v582_v24  ;;  %v586_v4 = vsel %vm1792_vm3, %v582_v24, %v576_v6  ;;  %v560_v32 = vpop.permute.xlu0 %559  ;;  %vm1803_vm14 = vnez %v1737_v30  ;;  %vm1804_vm3 = vnez %v1740_v34 }
 0x220   :  { %939 = vmatpush1.msk.msra.mxu0 %vm1794_vm2, %v586_v4  ;;  %954 = vmatprep.subr.msk.mxu1 %vm1795_vm11, %v583_v11  ;;  %vm1806_vm2 = vcmp.ge.s32.totalorder %v1151_v18, 1  ;;  %vm1807_vm11 = vmmov %vm1805_vm9 }
 0x221   :  { %955 = vmatpush1.msk.msra.mxu1 %vm1796_vm12, %v584_v25  ;;  %vm1808_vm12 = vmmov %vm1805_vm9 }
 0x222   :  { %v558_v19 = vpop.permute.xlu1 %557 }
 0x223   :  { %v565_v13 = vsel %vm1797_vm1, %v556_v15, %v558_v19  ;;  %v536_v33 = vpop.permute.xlu0 %535  ;;  %v564_v21 = vsel %vm1801_vm10, %v558_v19, %v560_v32  ;;  %vm1809_vm1 = vmmov %vm1805_vm9  ;;  %vm1813_vm10 = vcmp.lt.s32.totalorder %v1141_v8, 17 }
 0x224   :  { %940 = vmatprep.subr.msk.mxu0 %vm1798_vm13, %v565_v13  ;;  %vm1810_vm13 = vcmp.ge.s32.totalorder %v1147_v16, 1  ;;  %v679_v16 = vld [vmem:[%s1676_s3] sm:$0xff]  ;;  %s1030_s3 = smov [#allocation6]  }
 0x225   :  { %s885_s10 = sshll.u32 %s1030_s3, 4  ;;  %s886_s10 = int_to_ptr.vmem [resolvable:$true] %s885_s10 }
 0x226   :  { %v562_v35 = vpop.permute.xlu1 %561  ;;  %s995_s11 = scalar_lea.vmem %s886_s10, 512  ;;  %p1000_p6 = scmp.lt.s32.totalorder %s886_s10, %s886_s10 }
 0x227   :  { %v563_v36 = vsel %vm1799_vm15, %v560_v32, %v562_v35  ;;  %v566_v17 = vsel %vm1800_vm7, %v562_v35, %v556_v15  ;;  %v540_v23 = vpop.permute.xlu0 %539  ;;  %vm1811_vm15 = vcmp.ge.s32.totalorder %v1155_v20, 1  ;;  %vm1812_vm7 = vcmp.ge.s32.totalorder %v1159_v22, 1  ;;  %p996_p5 = scmp.ne.s32.totalorder %s886_s10, %s995_s11  ;;  %p1001_p7 = scmp.lt.s32.totalorder %s995_s11, %s995_s11 }
 0x228   :  { %941 = vmatpush1.msk.msra.mxu0 %vm1802_vm6, %v566_v17  ;;  %956 = vmatprep.subr.msk.mxu1 %vm1803_vm14, %v563_v36  ;;  %vm1814_vm6 = vnez %v1749_v49  ;;  %vm1815_vm14 = vmmov %vm1813_vm10 }
 0x229   :  { %957 = vmatpush1.msk.msra.mxu1 %vm1804_vm3, %v564_v21  ;;  %vm1816_vm3 = vmmov %vm1813_vm10  ;;  %p1002_p8 = por %p1001_p7, %p1000_p6 }
 0x22a   :  { %v538_v14 = vpop.permute.xlu1 %537 }
 0x22b   :  { %v545_v37 = vsel %vm1805_vm9, %v536_v33, %v538_v14  ;;  %v544_v30 = vsel %vm1809_vm1, %v538_v14, %v540_v23  ;;  %v516_v34 = vpop.permute.xlu0 %515  ;;  %vm1817_vm9 = vmmov %vm1816_vm3  ;;  %p1003_p9 = pnand %p1002_p8, %p996_p5 }
 0x22c   :  { %942 = vmatprep.subr.msk.mxu0 %vm1806_vm2, %v545_v37 }
 0x22e   :  { %v542_v38 = vpop.permute.xlu1 %541 }
 0x22f   :  { %v543_v39 = vsel %vm1807_vm11, %v540_v23, %v542_v38  ;;  %v546_v29 = vsel %vm1808_vm12, %v542_v38, %v536_v33  ;;  %v520_v41 = vpop.permute.xlu0 %519 }
 0x230   :  { %943 = vmatpush1.msk.msra.mxu0 %vm1810_vm13, %v546_v29  ;;  %958 = vmatprep.subr.msk.mxu1 %vm1811_vm15, %v543_v39 }
 0x231   :  { %959 = vmatpush1.msk.msra.mxu1 %vm1812_vm7, %v544_v30 }
 0x232   :  { %v518_v18 = vpop.permute.xlu1 %517 }
 0x233   :  { %v525_v40 = vsel %vm1813_vm10, %v516_v34, %v518_v18  ;;  %v524_v43 = vsel %vm1817_vm9, %v518_v18, %v520_v41 }
 0x234   :  { %944 = vmatprep.subr.msk.mxu0 %vm1814_vm6, %v525_v40 }
 0x236   :  { %v522_v42 = vpop.permute.xlu1 %521 }
 0x237   :  { %v523_v20 = vsel %vm1815_vm14, %v520_v41, %v522_v42  ;;  %v526_v22 = vsel %vm1816_vm3, %v522_v42, %v516_v34 }
 0x238   :  { %945 = vmatpush1.msk.msra.mxu0 %vm1415_vm8, %v526_v22  ;;  %960 = vmatprep.subr.msk.mxu1 %vm1423_vm0, %v523_v20 }
 0x239   :  { %896 = vmatmul.mubr.msk.f32.vlgmr.msra.gmra.mxu0 %vm365_vm5, %v679_v16  ;;  %961 = vmatpush1.msk.msra.mxu1 %vm1434_vm4, %v524_v43 }
 0x23a   :  { %897 = vmatmul.mubr.msk.f32.vlgmr.msra.gmra.mxu1 %vm365_vm5, %v679_v16 }
 0x23c   :  { %v720_v49 = vpop.permute.xlu0 %719 }
 0x2f9   :  { %v791_v44 = vpop.f32.mrf.mxu0 }
 0x2fa   :  { %v792_v27 = vadd.f32 %v791_v44, %v720_v49  ;;  %v862_v26 = vpop.f32.mrf.mxu1 }
 0x2fb   :  { %v863_v45 = vadd.f32 %v862_v26, %v720_v49  ;;  %v793_v8 = vpop.f32.mrf.mxu0 }
 0x2fc   :  { %v867_v50 = vadd.f32 %v792_v27, %v1066_v1  ;;  %v794_v54 = vadd.f32 %v793_v8, %v720_v49  ;;  %v864_v28 = vpop.f32.mrf.mxu1 }
 0x2fd   :  { %v869_v55 = vadd.f32 %v863_v45, %v1064_v0  ;;  %v865_v31 = vadd.f32 %v864_v28, %v720_v49 }
 0x2fe   :  { %v871_v52 = vmax.f32 %v867_v50, 0.0  ;;  %v868_v53 = vadd.f32 %v794_v54, %v1074_v3 }
 0x2ff   :  { %v873_v59 = vmax.f32 %v869_v55, 0.0  ;;  %v870_v56 = vadd.f32 %v865_v31, %v1072_v2 }
 0x300   :  { %875 = vst [vmem:[#allocation6] sm:$0xff] %v871_v52  ;;  %v872_v57 = vmax.f32 %v868_v53, 0.0 }
 0x301   :  { %877 = vst [vmem:[#allocation6 + $0x10] sm:$0xff] %v873_v59  ;;  %v874_v58 = vmax.f32 %v870_v56, 0.0 }
 0x302   :  { %876 = vst [vmem:[#allocation6 + $0x8] sm:$0xff] %v872_v57 }
 0x303   :  { %878 = vst [vmem:[#allocation6 + $0x18] sm:$0xff] %v874_v58 }
 0x304   :  { %1006 = shalt.err (!%p1003_p9)
}
 0x305   :  { %888 = dma.vmem_to_hbm [thread:$0]  %s886_s10, 512, %s1678_s5, [#allocation5]  }
 0x306   :  { %1017 = dma.done.wait [#allocation5], 512  }
 0x307   :  { %1018 = vsyncadd [#allocation5], 4294966784 }
 0x308   :  { %892 = vsyncpa [#allocation4], 1 }
 0x309   :  { %893 = vsyncpa [#allocation5], 1 }

</bundles_post_ra>
